<compile_context>
chip_gen: v7x
topology: tpu7x:2x2x1
jax: 0.10.0
libtpu: 0.0.40
codegen_flags: <defaults>
</compile_context>

<pallas_src>
import functools

import jax
import jax.numpy as jnp
from jax.experimental import pallas as pl
from jax.experimental.pallas import tpu as pltpu

emb_dim = 64
NODE_F = 2 * emb_dim            # per-node feature width fed to the edge model (128)
EDGE_F = 2 * emb_dim            # edge-attr feature width (128)
IN_F = 2 * NODE_F + EDGE_F      # 2*(2*emb_dim + emb_dim) = 384
HID_F = emb_dim                 # 64
OUT_F = emb_dim                 # 64


def _round_up(x, m):
    return (x + m - 1) // m * m


def edge_model_kernel(src_ref, dest_ref, edge_ref,
                      w1s_ref, w1d_ref, w1e_ref, b1_ref,
                      w2_ref, b2_ref, o_ref):
    """One tile of edges: (row-split) Linear -> ReLU -> Linear -> ReLU.

    cat([src, dest, edge], 1) @ W1 is computed as three K=128 matmuls against
    the row-split pieces of W1 (no concat buffer in VMEM). f32 inputs are cast
    to bf16 right before the MXU; accumulation, bias-add and ReLU stay f32
    (v5e-friendly: no bf16 VALU there).
    """
    bf16 = jnp.bfloat16
    h = jnp.dot(src_ref[...].astype(bf16), w1s_ref[...],
                preferred_element_type=jnp.float32)
    h += jnp.dot(dest_ref[...].astype(bf16), w1d_ref[...],
                 preferred_element_type=jnp.float32)
    h += jnp.dot(edge_ref[...].astype(bf16), w1e_ref[...],
                 preferred_element_type=jnp.float32)
    h = jnp.maximum(h + b1_ref[...], 0.0)                     # f32 bias + ReLU

    o = jnp.dot(h.astype(bf16), w2_ref[...],
                preferred_element_type=jnp.float32)
    o = jnp.maximum(o + b2_ref[...], 0.0)                     # f32 bias + ReLU
    o_ref[...] = o.astype(o_ref.dtype)


@functools.partial(jax.jit, static_argnames=("tile_e",))
def edge_model_forward(src, dest, edge_attr, u, batch, params, *, tile_e=4096):
    # u / batch are unused in EdgeModel.forward (kept for signature parity).
    del u, batch
    w1, b1, w2, b2 = params          # w1: [IN_F, HID_F] (= torch W1.T), b1: [1, HID_F]
    E = src.shape[0]
    out_dtype = jnp.float32

    # ---- weights: one-off, tiny (~100 KB) layout prep ----------------------
    cast = lambda a: a.astype(jnp.bfloat16)
    # Split W1 by input block so the kernel needs no concat.
    w1s = cast(w1[0:NODE_F])
    w1d = cast(w1[NODE_F:2 * NODE_F])
    w1e = cast(w1[2 * NODE_F:])
    w2b = cast(w2)
    b1f = b1.astype(jnp.float32)
    b2f = b2.astype(jnp.float32)

    # ---- tiling: cdiv grid, no padding of the edge dimension ---------------
    tile_e = max(8, _round_up(tile_e, 8))              # f32 sublane multiple
    # Cap tile so the grid has >= 2 steps whenever possible (v7x: both TCs busy).
    tile = max(8, min(tile_e, _round_up(-(-E // 2), 8)))
    grid = (pl.cdiv(E, tile),)

    full = lambda shape: pl.BlockSpec(shape, lambda i: (0, 0))
    cost = pl.CostEstimate(
        flops=2 * E * (IN_F * HID_F + HID_F * OUT_F),
        transcendentals=0,
        bytes_accessed=(3 * E * NODE_F * 4             # f32 inputs
                        + E * OUT_F * 4                # f32 output
                        + (IN_F * HID_F + HID_F * OUT_F) * 2   # bf16 weights
                        + (HID_F + OUT_F) * 4),        # f32 biases
    )

    out = pl.pallas_call(
        edge_model_kernel,
        out_shape=jax.ShapeDtypeStruct((E, OUT_F), out_dtype),
        grid_spec=pltpu.PrefetchScalarGridSpec(
            num_scalar_prefetch=0,
            grid=grid,
            in_specs=[
                pl.BlockSpec((tile, NODE_F), lambda i: (i, 0)),   # src (f32)
                pl.BlockSpec((tile, NODE_F), lambda i: (i, 0)),   # dest (f32)
                pl.BlockSpec((tile, EDGE_F), lambda i: (i, 0)),   # edge_attr (f32)
                full((NODE_F, HID_F)),                            # w1_src (bf16)
                full((NODE_F, HID_F)),                            # w1_dest (bf16)
                full((EDGE_F, HID_F)),                            # w1_edge (bf16)
                full((1, HID_F)),                                 # b1 (f32)
                full((HID_F, OUT_F)),                             # w2 (bf16)
                full((1, OUT_F)),                                 # b2 (f32)
            ],
            out_specs=pl.BlockSpec((tile, OUT_F), lambda i: (i, 0)),
        ),
        compiler_params=pltpu.CompilerParams(
            dimension_semantics=("parallel",)),
        cost_estimate=cost,
    )(src, dest, edge_attr, w1s, w1d, w1e, b1f, w2b, b2f)

    return out


def init_params(key):
    """Deterministic init mimicking nn.Linear default (uniform +/- 1/sqrt(fan_in))."""
    k1, k2, k3, k4 = jax.random.split(key, 4)
    lim1 = 1.0 / jnp.sqrt(IN_F)
    lim2 = 1.0 / jnp.sqrt(HID_F)
    w1 = jax.random.uniform(k1, (IN_F, HID_F), jnp.float32, -lim1, lim1)
    b1 = jax.random.uniform(k2, (1, HID_F), jnp.float32, -lim1, lim1)
    w2 = jax.random.uniform(k3, (HID_F, OUT_F), jnp.float32, -lim2, lim2)
    b2 = jax.random.uniform(k4, (1, OUT_F), jnp.float32, -lim2, lim2)
    return w1, b1, w2, b2


if __name__ == "__main__":
    key = jax.random.PRNGKey(0)
    kp, ks, kd, ke, ku = jax.random.split(key, 5)

    E = 16          # number of edges (small test size; kernel handles any E)
    B = 2           # number of graphs (only used for u / batch placeholders)

    params = init_params(kp)
    src = jax.random.normal(ks, (E, NODE_F), jnp.float32)
    dest = jax.random.normal(kd, (E, NODE_F), jnp.float32)
    edge_attr = jax.random.normal(ke, (E, EDGE_F), jnp.float32)
    u = jax.random.normal(ku, (B, emb_dim), jnp.float32)         # unused by forward
    batch = jnp.zeros((E,), jnp.int32)                           # unused by forward

    out = edge_model_forward(src, dest, edge_attr, u, batch, params)
    jax.block_until_ready(out)

    # sanity check against a plain-JAX reference of the same (bf16-matmul) math
    w1, b1, w2, b2 = params
    x = jnp.concatenate([src, dest, edge_attr], axis=1)
    h_ref = jnp.maximum(
        jnp.dot(x.astype(jnp.bfloat16), w1.astype(jnp.bfloat16),
                preferred_element_type=jnp.float32) + b1, 0.0)
    ref = jnp.maximum(
        jnp.dot(h_ref.astype(jnp.bfloat16), w2.astype(jnp.bfloat16),
                preferred_element_type=jnp.float32) + b2, 0.0)

    assert out.shape == (E, OUT_F)
    assert jnp.allclose(out, ref, atol=2e-2, rtol=2e-2)

    print("KERNEL_OK")
</pallas_src>

<mosaic_0001>
module attributes {stable_mosaic.version = 11 : i64} {
  func.func @edge_model_kernel(%arg0: i32, %arg1: memref<8x128xf32, #tpu.memory_space<vmem>>, %arg2: memref<8x128xf32, #tpu.memory_space<vmem>>, %arg3: memref<8x128xf32, #tpu.memory_space<vmem>>, %arg4: memref<128x64xbf16, #tpu.memory_space<vmem>>, %arg5: memref<128x64xbf16, #tpu.memory_space<vmem>>, %arg6: memref<128x64xbf16, #tpu.memory_space<vmem>>, %arg7: memref<1x64xf32, #tpu.memory_space<vmem>>, %arg8: memref<64x64xbf16, #tpu.memory_space<vmem>>, %arg9: memref<1x64xf32, #tpu.memory_space<vmem>>, %arg10: memref<8x64xf32, #tpu.memory_space<vmem>>) attributes {dimension_semantics = [#tpu.dimension_semantics<parallel>], iteration_bounds = array<i64: 2>, scalar_prefetch = 0 : i64, scratch_operands = 0 : i64, tpu.core_type = #tpu.core_type<tc>, window_params = [{transform_indices = @transform_0, window_bounds = array<i64: 8, 128>}, {transform_indices = @transform_1, window_bounds = array<i64: 8, 128>}, {transform_indices = @transform_2, window_bounds = array<i64: 8, 128>}, {pipeline_mode = #tpu.pipeline_mode<synchronous>, transform_indices = @transform_3, window_bounds = array<i64: 128, 64>}, {pipeline_mode = #tpu.pipeline_mode<synchronous>, transform_indices = @transform_4, window_bounds = array<i64: 128, 64>}, {pipeline_mode = #tpu.pipeline_mode<synchronous>, transform_indices = @transform_5, window_bounds = array<i64: 128, 64>}, {pipeline_mode = #tpu.pipeline_mode<synchronous>, transform_indices = @transform_6, window_bounds = array<i64: 1, 64>}, {pipeline_mode = #tpu.pipeline_mode<synchronous>, transform_indices = @transform_7, window_bounds = array<i64: 64, 64>}, {pipeline_mode = #tpu.pipeline_mode<synchronous>, transform_indices = @transform_8, window_bounds = array<i64: 1, 64>}, {transform_indices = @transform_9, window_bounds = array<i64: 8, 64>}]} {
    %c0 = arith.constant 0 : index
    %c0_0 = arith.constant 0 : index
    %0 = vector.load %arg1[%c0, %c0_0] : memref<8x128xf32, #tpu.memory_space<vmem>>, vector<8x128xf32>
    %1 = arith.truncf %0 : vector<8x128xf32> to vector<8x128xbf16>
    %c0_1 = arith.constant 0 : index
    %c0_2 = arith.constant 0 : index
    %2 = vector.load %arg4[%c0_1, %c0_2] : memref<128x64xbf16, #tpu.memory_space<vmem>>, vector<128x64xbf16>
    %cst = arith.constant dense<0.000000e+00> : vector<8x64xf32>
    %3 = tpu.matmul %1, %2, %cst {dimension_numbers = #tpu.dot_dimension_numbers<[1], [0], [0], [1], [0, 0, 1, 1], [], []>} : vector<8x128xbf16>, vector<128x64xbf16>, vector<8x64xf32> -> vector<8x64xf32>
    %c0_3 = arith.constant 0 : index
    %c0_4 = arith.constant 0 : index
    %4 = vector.load %arg2[%c0_3, %c0_4] : memref<8x128xf32, #tpu.memory_space<vmem>>, vector<8x128xf32>
    %5 = arith.truncf %4 : vector<8x128xf32> to vector<8x128xbf16>
    %c0_5 = arith.constant 0 : index
    %c0_6 = arith.constant 0 : index
    %6 = vector.load %arg5[%c0_5, %c0_6] : memref<128x64xbf16, #tpu.memory_space<vmem>>, vector<128x64xbf16>
    %cst_7 = arith.constant dense<0.000000e+00> : vector<8x64xf32>
    %7 = tpu.matmul %5, %6, %cst_7 {dimension_numbers = #tpu.dot_dimension_numbers<[1], [0], [0], [1], [0, 0, 1, 1], [], []>} : vector<8x128xbf16>, vector<128x64xbf16>, vector<8x64xf32> -> vector<8x64xf32>
    %8 = arith.addf %3, %7 : vector<8x64xf32>
    %c0_8 = arith.constant 0 : index
    %c0_9 = arith.constant 0 : index
    %9 = vector.load %arg3[%c0_8, %c0_9] : memref<8x128xf32, #tpu.memory_space<vmem>>, vector<8x128xf32>
    %10 = arith.truncf %9 : vector<8x128xf32> to vector<8x128xbf16>
    %c0_10 = arith.constant 0 : index
    %c0_11 = arith.constant 0 : index
    %11 = vector.load %arg6[%c0_10, %c0_11] : memref<128x64xbf16, #tpu.memory_space<vmem>>, vector<128x64xbf16>
    %cst_12 = arith.constant dense<0.000000e+00> : vector<8x64xf32>
    %12 = tpu.matmul %10, %11, %cst_12 {dimension_numbers = #tpu.dot_dimension_numbers<[1], [0], [0], [1], [0, 0, 1, 1], [], []>} : vector<8x128xbf16>, vector<128x64xbf16>, vector<8x64xf32> -> vector<8x64xf32>
    %13 = arith.addf %8, %12 : vector<8x64xf32>
    %c0_13 = arith.constant 0 : index
    %c0_14 = arith.constant 0 : index
    %14 = vector.load %arg7[%c0_13, %c0_14] : memref<1x64xf32, #tpu.memory_space<vmem>>, vector<1x64xf32>
    %15 = vector.broadcast %14 : vector<1x64xf32> to vector<8x64xf32>
    %16 = arith.addf %13, %15 : vector<8x64xf32>
    %cst_15 = arith.constant 0.000000e+00 : f32
    %17 = vector.broadcast %cst_15 : f32 to vector<8x64xf32>
    %18 = arith.maximumf %16, %17 : vector<8x64xf32>
    %19 = arith.truncf %18 : vector<8x64xf32> to vector<8x64xbf16>
    %c0_16 = arith.constant 0 : index
    %c0_17 = arith.constant 0 : index
    %20 = vector.load %arg8[%c0_16, %c0_17] : memref<64x64xbf16, #tpu.memory_space<vmem>>, vector<64x64xbf16>
    %cst_18 = arith.constant dense<0.000000e+00> : vector<8x64xf32>
    %21 = tpu.matmul %19, %20, %cst_18 {dimension_numbers = #tpu.dot_dimension_numbers<[1], [0], [0], [1], [0, 0, 1, 1], [], []>} : vector<8x64xbf16>, vector<64x64xbf16>, vector<8x64xf32> -> vector<8x64xf32>
    %c0_19 = arith.constant 0 : index
    %c0_20 = arith.constant 0 : index
    %22 = vector.load %arg9[%c0_19, %c0_20] : memref<1x64xf32, #tpu.memory_space<vmem>>, vector<1x64xf32>
    %23 = vector.broadcast %22 : vector<1x64xf32> to vector<8x64xf32>
    %24 = arith.addf %21, %23 : vector<8x64xf32>
    %cst_21 = arith.constant 0.000000e+00 : f32
    %25 = vector.broadcast %cst_21 : f32 to vector<8x64xf32>
    %26 = arith.maximumf %24, %25 : vector<8x64xf32>
    %c0_22 = arith.constant 0 : index
    %c0_23 = arith.constant 0 : index
    %27 = vector.load %arg10[%c0_22, %c0_23] : memref<8x64xf32, #tpu.memory_space<vmem>>, vector<8x64xf32>
    tpu.vector_store %arg10[%c0_22, %c0_23], %26 {strides = array<i32>} : memref<8x64xf32, #tpu.memory_space<vmem>>, vector<8x64xf32>,
    return
  }
  func.func @transform_0(%arg0: i32) -> (i32, i32) {
    %c0_i32 = arith.constant 0 : i32
    %c0_i32_0 = arith.constant 0 : i32
    return %arg0, %c0_i32 : i32, i32
  }
  func.func @transform_1(%arg0: i32) -> (i32, i32) {
    %c0_i32 = arith.constant 0 : i32
    %c0_i32_0 = arith.constant 0 : i32
    return %arg0, %c0_i32 : i32, i32
  }
  func.func @transform_2(%arg0: i32) -> (i32, i32) {
    %c0_i32 = arith.constant 0 : i32
    %c0_i32_0 = arith.constant 0 : i32
    return %arg0, %c0_i32 : i32, i32
  }
  func.func @transform_3(%arg0: i32) -> (i32, i32) {
    %c0_i32 = arith.constant 0 : i32
    %c0_i32_0 = arith.constant 0 : i32
    %c0_i32_1 = arith.constant 0 : i32
    return %c0_i32, %c0_i32_0 : i32, i32
  }
  func.func @transform_4(%arg0: i32) -> (i32, i32) {
    %c0_i32 = arith.constant 0 : i32
    %c0_i32_0 = arith.constant 0 : i32
    %c0_i32_1 = arith.constant 0 : i32
    return %c0_i32, %c0_i32_0 : i32, i32
  }
  func.func @transform_5(%arg0: i32) -> (i32, i32) {
    %c0_i32 = arith.constant 0 : i32
    %c0_i32_0 = arith.constant 0 : i32
    %c0_i32_1 = arith.constant 0 : i32
    return %c0_i32, %c0_i32_0 : i32, i32
  }
  func.func @transform_6(%arg0: i32) -> (i32, i32) {
    %c0_i32 = arith.constant 0 : i32
    %c0_i32_0 = arith.constant 0 : i32
    %c0_i32_1 = arith.constant 0 : i32
    return %c0_i32, %c0_i32_0 : i32, i32
  }
  func.func @transform_7(%arg0: i32) -> (i32, i32) {
    %c0_i32 = arith.constant 0 : i32
    %c0_i32_0 = arith.constant 0 : i32
    %c0_i32_1 = arith.constant 0 : i32
    return %c0_i32, %c0_i32_0 : i32, i32
  }
  func.func @transform_8(%arg0: i32) -> (i32, i32) {
    %c0_i32 = arith.constant 0 : i32
    %c0_i32_0 = arith.constant 0 : i32
    %c0_i32_1 = arith.constant 0 : i32
    return %c0_i32, %c0_i32_0 : i32, i32
  }
  func.func @transform_9(%arg0: i32) -> (i32, i32) {
    %c0_i32 = arith.constant 0 : i32
    %c0_i32_0 = arith.constant 0 : i32
    return %arg0, %c0_i32 : i32, i32
  }
}

</mosaic_0001>

<bundles_post_ra>
// kernel: edge_model_forward.1
= control target key start
LH: loop header
LB: loop body
LE: loop exit
PB: predicated region body
PF: predicated region fallthrough
CT: control target
= control target key end

     0   :  { %14 = vsyncpa [#allocation3], 0  ;;  %s1446_s0 = inlined_call_operand.vmem [shape: f32[16,128], index: 0, kind: input, shape index: {}]   ;;  %s1447_s1 = inlined_call_operand.vmem [shape: f32[16,128], index: 1, kind: input, shape index: {}]   ;;  %s1448_s2 = inlined_call_operand.vmem [shape: f32[16,128], index: 2, kind: input, shape index: {}]   ;;  %s1449_s3 = inlined_call_operand.vmem [shape: bf16[128,64], index: 3, kind: input, shape index: {}]   ;;  %s1450_s4 = inlined_call_operand.vmem [shape: bf16[128,64], index: 4, kind: input, shape index: {}]   ;;  %s1451_s5 = inlined_call_operand.vmem [shape: bf16[128,64], index: 5, kind: input, shape index: {}]   ;;  %s1452_s6 = inlined_call_operand.vmem [shape: f32[1,64], index: 6, kind: input, shape index: {}]   ;;  %s1453_s7 = inlined_call_operand.vmem [shape: bf16[64,64], index: 7, kind: input, shape index: {}]   ;;  %s1454_s8 = inlined_call_operand.vmem [shape: f32[1,64], index: 8, kind: input, shape index: {}]   ;;  %s1455_s9 = inlined_call_operand.hbm [shape: f32[16,64], index: 9, kind: output, shape index: {}]  }
   0x1   :  { %16 = vsyncpa [#allocation3 + $0x1], 0  ;;  %s1207_s30 = smov 0   ;;  %s1209_s10 = smov 0  }
   0x2   :  { %s1211_s11 = smov 0   ;;  %s1213_s12 = smov 0  }
   0x3 LB: > { %s1228_s13 = sadd.s32 4294967295, %s1152_s12   ;;  %s874_s14 = sadd.s32 4294967294, %s1152_s12   ;;  %s1152_s12 = sphi %s1213_s12, %s1461_s12   ;;  %s1148_s11 = sphi %s1211_s11, %s1460_s11   ;;  %s1144_s10 = sphi %s1209_s10, %s1459_s10   ;;  %s1140_s30 = sphi %s1207_s30, %s1458_s30  }
   0x4   : > { %s1232_s15 = sadd.s32 1, %s1152_s12   ;;  %s233_s16 = sadd.s32 1, %s1148_s11 }
   0x5   : > { %s230_s17 = ssub.s32 %s1152_s12, %s1232_s15  ;;  %p243_p0 = scmp.ne.s32.totalorder %s1148_s11, %s1144_s10 }
   0x6   : > { %p231_p1 = scmp.eq.s32.totalorder %s230_s17, 0  ;;  %p244_p2 = scmp.eq.s32.totalorder %s1228_s13, 1 }
   0x7   : > { %p249_p3 = scmp.ne.s32.totalorder %s1144_s10, %s1140_s30  ;;  %p250_p4 = scmp.eq.s32.totalorder %s874_s14, 1 }
   0x8   : > { %s1243_s18 = scalar_select %p231_p1, %s1148_s11, %s233_s16  }
   0x9   : > { %p1245_p5 = por %p244_p2, %p243_p0  ;;  %p1249_p6 = por %p250_p4, %p249_p3 }
   0xa   : > { %p877_p7 = scmp.ge.s32.totalorder %s1152_s12, 1  ;;  %p307_p8 = scmp.lt.s32.totalorder %s1152_s12, 3 }
   0xc   : > { %p308_p9 = pnand %p877_p7, %p307_p8 }
   0xd   : > { %v1062_v0 = vld [vmem:[%s1450_s4] sm:$0xff] (!%p308_p9)   ;;  %v1154_v1 = vmov (!%p308_p9), 0.0   ;;  %v1064_v3 = vld [vmem:[%s1450_s4 + $0x8] sm:$0xff] (!%p308_p9)   ;;  %vm1155_vm0 = vmmov (!%p308_p9), 0   ;;  %v1066_v5 = vld [vmem:[%s1450_s4 + $0x10] sm:$0xff] (!%p308_p9)   ;;  %p350_p10 = scmp.lt.s32.totalorder (!%p308_p9), %s1228_s13, 1 }
   0xe   : > { %311 = sbr.rel (%p308_p9) target bundleno = 528 (0x210), region = 56  ;;  %949 = vmatprep.subr.bf16.mxu0 (!%p308_p9), %v1154_v1  ;;  %969 = vmatprep.subr.bf16.mxu1 (!%p308_p9), %v1154_v1  ;;  %v1063_v2 = vld [vmem:[%s1449_s3] sm:$0xff] (!%p308_p9)   ;;  %v1065_v4 = vld [vmem:[%s1449_s3 + $0x8] sm:$0xff] (!%p308_p9)   ;;  %v1067_v6 = vld [vmem:[%s1449_s3 + $0x10] sm:$0xff] (!%p308_p9)   ;;  %vm731_vm1 = vcmask (!%p308_p9), 523264   ;;  %s347_s21 = sand.u32 (!%p308_p9), 1, %s1144_s10  }
   0xf   : > { %950 = vmatpush3.bf16.msra.mxu0 (!%p308_p9), %v1062_v0  ;;  %965 = vmatprep.mubr.msk.bf16.mxu0 (!%p308_p9), %vm1155_vm0, %v1154_v1  ;;  %v1068_v7 = vld [vmem:[%s1450_s4 + $0x18] sm:$0xff] (!%p308_p9)   ;;  %v1070_v9 = vld [vmem:[%s1450_s4 + $0x20] sm:$0xff] (!%p308_p9)   ;;  %v1072_v11 = vld [vmem:[%s1450_s4 + $0x28] sm:$0xff] (!%p308_p9)   ;;  %s878_s22 = sshll.u32 (!%p308_p9), %s347_s21, 3  ;;  %s914_s26 = sshll.u32 (!%p308_p9), %s1228_s13, 7 }
  0x10   : > { %970 = vmatpush3.bf16.msra.mxu1 (!%p308_p9), %v1063_v2  ;;  %951 = vmatprep.subr.bf16.mxu0 (!%p308_p9), %v1154_v1  ;;  %v1069_v8 = vld [vmem:[%s1449_s3 + $0x18] sm:$0xff] (!%p308_p9)   ;;  %v1071_v10 = vld [vmem:[%s1449_s3 + $0x20] sm:$0xff] (!%p308_p9)   ;;  %v1073_v12 = vld [vmem:[%s1449_s3 + $0x28] sm:$0xff] (!%p308_p9)   ;;  %s349_s28 = scalar_lea.vmem (!%p308_p9), [#allocation2], %s878_s22  ;;  %s1403_s29 = scalar_lea.hbm (!%p308_p9), %s1455_s9, %s914_s26 }
  0x11   : > { %971 = vmatprep.subr.bf16.mxu1 (!%p308_p9), %v1154_v1  ;;  %985 = vmatprep.mubr.msk.bf16.mxu1 (!%p308_p9), %vm1155_vm0, %v1154_v1  ;;  %v1074_v13 = vld [vmem:[%s1450_s4 + $0x30] sm:$0xff] (!%p308_p9)   ;;  %v1076_v15 = vld [vmem:[%s1450_s4 + $0x38] sm:$0xff] (!%p308_p9)   ;;  %v1078_v21 = vld [vmem:[%s1451_s5] sm:$0xff] (!%p308_p9)  }
  0x12   : > { %v1075_v14 = vld [vmem:[%s1449_s3 + $0x30] sm:$0xff] (!%p308_p9)   ;;  %v1077_v17 = vld [vmem:[%s1449_s3 + $0x38] sm:$0xff] (!%p308_p9)   ;;  %v1079_v22 = vld [vmem:[%s1451_s5 + $0x8] sm:$0xff] (!%p308_p9)  }
  0x13   : > { %952 = vmatpush3.bf16.msra.mxu0 (!%p308_p9), %v1064_v3  ;;  %v1080_v23 = vld [vmem:[%s1451_s5 + $0x10] sm:$0xff] (!%p308_p9)   ;;  %v1081_v24 = vld [vmem:[%s1451_s5 + $0x18] sm:$0xff] (!%p308_p9)   ;;  %v1082_v25 = vld [vmem:[%s1451_s5 + $0x20] sm:$0xff] (!%p308_p9)  }
  0x14   : > { %972 = vmatpush3.bf16.msra.mxu1 (!%p308_p9), %v1065_v4  ;;  %953 = vmatprep.subr.bf16.mxu0 (!%p308_p9), %v1154_v1  ;;  %v1083_v26 = vld [vmem:[%s1451_s5 + $0x28] sm:$0xff] (!%p308_p9)   ;;  %v1084_v27 = vld [vmem:[%s1451_s5 + $0x30] sm:$0xff] (!%p308_p9)   ;;  %v1085_v28 = vld [vmem:[%s1451_s5 + $0x38] sm:$0xff] (!%p308_p9)  }
  0x15   : > { %973 = vmatprep.subr.bf16.mxu1 %v1154_v1  ;;  %s351_s27 = scalar_select %p350_p10, %s1228_s13, 1  ;;  %v1086_v31 = vld [vmem:[%s1453_s7] sm:$0xff]   ;;  %v1087_v32 = vld [vmem:[%s1453_s7 + $0x8] sm:$0xff]   ;;  %v1088_v33 = vld [vmem:[%s1453_s7 + $0x10] sm:$0xff]  }
  0x16   : > { %v1089_v34 = vld [vmem:[%s1453_s7 + $0x18] sm:$0xff]   ;;  %v906_v45 = vld [vmem:[%s1452_s6] ss:$0 sm:$0xff]  ;;  %s778_s13 = scalar_lea.sflag [#allocation3], %s347_s21 }
  0x17   : > { %954 = vmatpush3.bf16.msra.mxu0 %v1066_v5  ;;  %s1304_s17 = sshll.u32 %s351_s27, 3  ;;  %v907_v53 = vld [vmem:[%s1454_s8] ss:$0 sm:$0xff] }
  0x18   : > { %974 = vmatpush3.bf16.msra.mxu1 %v1067_v6  ;;  %955 = vmatprep.subr.bf16.mxu0 %v1154_v1  ;;  %s357_s25 = scalar_lea.vmem %s1447_s1, %s1304_s17  ;;  %s353_s23 = scalar_lea.vmem %s1446_s0, %s1304_s17 }
  0x19   : > { %975 = vmatprep.subr.bf16.mxu1 %v1154_v1  ;;  %v381_v16 = vld [vmem:[%s357_s25] sm:$0xff]  ;;  %s361_s16 = scalar_lea.vmem %s1448_s2, %s1304_s17  ;;  %s791_s17 = sshll.u32 %s349_s28, 4  ;;  %s1405_s17 = int_to_ptr.vmem [resolvable:$true] %s791_s17 }
  0x1a   : > { %v363_v18 = vld [vmem:[%s353_s23] sm:$0xff]  ;;  %v382_v19 = vpack.c.bf16 %v381_v16, %v381_v16  ;;  %s1090_s14 = scalar_lea.vmem %s1405_s17, 128 }
  0x1b   : > { %956 = vmatpush3.bf16.msra.mxu0 %v1068_v7  ;;  %v364_v20 = vpack.c.bf16 %v363_v18, %v363_v18  ;;  %v575_v29 = vld [vmem:[%s361_s16] sm:$0xff]  ;;  %p1091_p11 = scmp.ne.s32.totalorder %s1405_s17, %s1090_s14  ;;  %s1156_s16 = smov [#allocation2]  }
  0x1c   : > { %976 = vmatpush3.bf16.msra.mxu1 %v1069_v8  ;;  %957 = vmatprep.subr.bf16.mxu0 %v1154_v1  ;;  %v576_v30 = vpack.c.bf16 %v575_v29, %v575_v29  ;;  %s1094_s22 = sshll.u32 %s1156_s16, 4  ;;  %s1095_s22 = int_to_ptr.vmem [resolvable:$false] %s1094_s22 }
  0x1d   : > { %977 = vmatprep.subr.bf16.mxu1 %v1154_v1  ;;  %p1092_p12 = pnand %p1091_p11, %p1245_p5  ;;  %s1096_s23 = scalar_lea.vmem %s1095_s22, 256 }
  0x1e   : > { %p1097_p0 = scmp.lt.s32.totalorder %s1405_s17, %s1095_s22  ;;  %p1098_p1 = scmp.lt.s32.totalorder %s1096_s23, %s1090_s14 }
  0x1f   : > { %958 = vmatpush3.bf16.msra.mxu0 %v1070_v9  ;;  %p1093_p13 = pneg %p1092_p12 }
  0x20   : > { %978 = vmatpush3.bf16.msra.mxu1 %v1071_v10  ;;  %959 = vmatprep.subr.bf16.mxu0 %v1154_v1  ;;  %p1099_p2 = por %p1098_p1, %p1097_p0 }
  0x21   : > { %979 = vmatprep.subr.bf16.mxu1 %v1154_v1 }
  0x22   : > { %p1100_p3 = pnand %p1099_p2, %p1093_p13 }
  0x23   : > { %960 = vmatpush3.bf16.msra.mxu0 %v1072_v11 }
  0x24   : > { %980 = vmatpush3.bf16.msra.mxu1 %v1073_v12  ;;  %961 = vmatprep.subr.bf16.mxu0 %v1154_v1 }
  0x25   : > { %981 = vmatprep.subr.bf16.mxu1 %v1154_v1 }
  0x27   : > { %962 = vmatpush3.bf16.msra.mxu0 %v1074_v13 }
  0x28   : > { %982 = vmatpush3.bf16.msra.mxu1 %v1075_v14  ;;  %963 = vmatprep.subr.bf16.mxu0 %v1154_v1 }
  0x29   : > { %983 = vmatprep.subr.bf16.mxu1 %v1154_v1 }
  0x2b   : > { %964 = vmatpush3.bf16.msra.mxu0 %v1076_v15 }
  0x2c   : > { %984 = vmatpush3.bf16.msra.mxu1 %v1077_v17  ;;  %989 = vmatprep.subr.bf16.mxu0 %v1154_v1 }
  0x2d   : > { %1009 = vmatprep.subr.bf16.mxu1 %v1154_v1 }
  0x2e   : > { %966 = vmatmul.mubr.bf16.vlgmr.msra.gmra.mrb[0].mxu0 %v382_v19 }
  0x2f   : > { %986 = vmatmul.mubr.bf16.vlgmr.msra.gmra.mrb[0].mxu1 %v364_v20  ;;  %990 = vmatpush3.bf16.msra.mxu0 %v1078_v21 }
  0x30   : > { %991 = vmatprep.subr.bf16.mxu0 %v1154_v1  ;;  %1005 = vmatprep.mubr.msk.bf16.mxu0 %vm1155_vm0, %v1154_v1 }
  0x31   : > { %1017 = vmatprep.mubr.msk.bf16.mxu1 %vm1155_vm0, %v1154_v1  ;;  %1010 = vmatpush3.bf16.msra.mxu1 %v1086_v31 }
  0x32   : > { %1011 = vmatprep.subr.bf16.mxu1 %v1154_v1 }
  0x33   : > { %992 = vmatpush3.bf16.msra.mxu0 %v1079_v22 }
  0x34   : > { %993 = vmatprep.subr.bf16.mxu0 %v1154_v1 }
  0x35   : > { %1012 = vmatpush3.bf16.msra.mxu1 %v1087_v32 }
  0x36   : > { %1013 = vmatprep.subr.bf16.mxu1 %v1154_v1 }
  0x37   : > { %994 = vmatpush3.bf16.msra.mxu0 %v1080_v23 }
  0x38   : > { %995 = vmatprep.subr.bf16.mxu0 %v1154_v1 }
  0x39   : > { %1014 = vmatpush3.bf16.msra.mxu1 %v1088_v33 }
  0x3a   : > { %1015 = vmatprep.subr.bf16.mxu1 %v1154_v1 }
  0x3b   : > { %996 = vmatpush3.bf16.msra.mxu0 %v1081_v24 }
  0x3c   : > { %997 = vmatprep.subr.bf16.mxu0 %v1154_v1 }
  0x3d   : > { %1016 = vmatpush3.bf16.msra.mxu1 %v1089_v34 }
  0x3f   : > { %998 = vmatpush3.bf16.msra.mxu0 %v1082_v25 }
  0x40   : > { %999 = vmatprep.subr.bf16.mxu0 %v1154_v1 }
  0x43   : > { %1000 = vmatpush3.bf16.msra.mxu0 %v1083_v26 }
  0x44   : > { %1001 = vmatprep.subr.bf16.mxu0 %v1154_v1 }
  0x47   : > { %1002 = vmatpush3.bf16.msra.mxu0 %v1084_v27 }
  0x48   : > { %1003 = vmatprep.subr.bf16.mxu0 %v1154_v1 }
  0x4b   : > { %1004 = vmatpush3.bf16.msra.mxu0 %v1085_v28 }
  0x4e   : > { %1006 = vmatmul.mubr.bf16.vlgmr.msra.gmra.mrb[4].mxu0 %v576_v30 }
 0x101   : > { %v481_v35 = vpop.f32.mrb[0].mxu0 }
 0x102   : > { %v967_v36 = vpop.f32.mrb[1].mxu0  ;;  %v569_v37 = vpop.f32.mrb[0].mxu1 }
 0x103   : > { %v570_v38 = vadd.f32 %v569_v37, %v481_v35  ;;  %v484_v39 = vpop.f32.mrb[2].mxu0  ;;  %v987_v40 = vpop.f32.mrb[1].mxu1 }
 0x104   : > { %v968_v41 = vpop.f32.mrb[3].mxu0  ;;  %v572_v42 = vpop.f32.mrb[2].mxu1 }
 0x105   : > { %v988_v43 = vpop.f32.mrb[3].mxu1 }
 0x121   : > { %v675_v44 = vpop.f32.mrb[4].mxu0 }
 0x122   : > { %v681_v46 = vadd.f32 %v675_v44, %v570_v38  ;;  %v1007_v47 = vpop.f32.mrb[5].mxu0 }
 0x123   : > { %v678_v48 = vpop.f32.mrb[6].mxu0 }
 0x124   : > { %v689_v49 = vadd.f32 %v906_v45, %v681_v46  ;;  %v1008_v50 = vpop.f32.mrb[7].mxu0 }
 0x126   : > { %v690_v51 = vmax.f32 %v689_v49, 0.0 }
 0x128   : > { %v691_v52 = vpack.c.bf16 %v690_v51, %v690_v51 }
 0x12a   : > { %1018 = vmatmul.mubr.msk.bf16.vlgmr.msra.gmra.mrb[4].mxu1 %vm731_vm1, %v691_v52 }
 0x1fd   : > { %v769_v54 = vpop.f32.mrb[4].mxu1 }
 0x1fe   : > { %v770_v55 = vadd.f32 %v907_v53, %v769_v54  ;;  %v1019_v56 = vpop.f32.mrb[5].mxu1 }
 0x1ff   : > { %v772_v57 = vpop.f32.mrb[6].mxu1 }
 0x200   : > { %v775_v58 = vmax.f32 %v770_v55, 0.0  ;;  %v1020_v59 = vpop.f32.mrb[7].mxu1 }
 0x202   : > { %776 = vst.msk [vmem:[%s349_s28] sm:$0xff] %vm731_vm1, %v775_v58 }
 0x203   : > { %1103 = shalt.err (!%p1100_p3)
}
 0x204   : > { %s1104_s21 = scalar_lea.hbm %s1403_s29, 128  ;;  %s1108_s28 = scalar_lea.hbm %s1455_s9, 256 }
 0x205   : > { %p1105_p4 = scmp.ne.s32.totalorder %s1403_s29, %s1104_s21  ;;  %p1109_p9 = scmp.lt.u32.totalorder %s1403_s29, %s1455_s9 }
 0x206   : > { %p1110_p10 = scmp.lt.u32.totalorder %s1108_s28, %s1104_s21  ;;  %p1112_p12 = scmp.lt.u32.totalorder %s1104_s21, %s1403_s29 }
 0x207   : > { %p1106_p7 = pnand %p1105_p4, %p1245_p5 }
 0x208   : > { %p1111_p11 = por %p1110_p10, %p1109_p9 }
 0x209   : > { %p1107_p8 = pneg %p1106_p7 }
 0x20a   : > { %p1113_p13 = por %p1112_p12, %p1111_p11 }
 0x20c   : > { %p1114_p0 = pnand %p1113_p13, %p1107_p8 }
 0x20e   : > { %1117 = shalt.err (!%p1114_p0)
}
 0x20f   : > { %1021 = dma.vmem_to_hbm [thread:$0]  (%p1245_p5), %s1405_s17, 128, %s1403_s29, %s778_s13  }
 0x210 PF: > { %p1027_p1 = scmp.ge.s32.totalorder %s1152_s12, 2  ;;  %s803_s14 = sand.u32 1, %s1140_s30  }
 0x211   : > { %s804_s16 = scalar_lea.sflag [#allocation3], %s803_s14 }
 0x212   : > { %p1024_p2 = pnand %p1027_p1, %p1249_p6 }
 0x214   : > { %1135 = dma.done.wait (!%p1024_p2), %s804_s16, 128  }
 0x215   : > { %1137 = vsyncadd (!%p1024_p2), %s804_s16, 4294967168  ;;  %p19_p3 = scmp.ge.s32.totalorder %s1232_s15, 4   ;;  %s1458_s30 = smov %s1144_s10 }
 0x216   : > { %s1459_s10 = smov %s1148_s11  ;;  %s1460_s11 = smov %s1243_s18 }
 0x217   : > { %s1461_s12 = smov %s1232_s15  ;;  %21 = sbr.rel (!%p19_p3) target bundleno = 3 (0x3), region = 97 }
 0x21e   :  { %809 = vsyncpa [#allocation3], 1 }
 0x21f   :  { %811 = vsyncpa [#allocation3 + $0x1], 1 }

</bundles_post_ra>
